<compile_context>
chip_gen: v7x
topology: tpu7x:2x2x1
jax: 0.10.0
libtpu: 0.0.40
codegen_flags: <defaults>
</compile_context>

<pallas_src>
import functools

import jax
import jax.numpy as jnp
from jax.experimental import pallas as pl
from jax.experimental.pallas import tpu as pltpu


def _round_up(x, m):
    return ((x + m - 1) // m) * m


def _choose_s_tile(s, max_tile=512):
    """Largest multiple-of-128 divisor of `s` up to `max_tile` (else full s)."""
    if s % 128 == 0:
        for t in range(min(max_tile, s), 0, -128):
            if s % t == 0:
                return t
    return s


def _pad_2d(a, rows, cols, dtype):
    a = jnp.asarray(a, dtype)
    return jnp.pad(a, ((0, rows - a.shape[0]), (0, cols - a.shape[1])))


def _simsiam_kernel(v1_ref, v2_ref,
                    we1_ref, be1_ref, we2_ref, be2_ref,   # encoder projection MLP
                    wp1_ref, bp1_ref, wp2_ref, bp2_ref,   # predictor MLPhead
                    loss_ref,                             # (1, B_TILE) f32 output
                    acc_ref,                              # (2*B_TILE, C) f32 scratch
                    *, b_tile, inv_spatial):
    s_idx = pl.program_id(1)

    @pl.when(s_idx == 0)
    def _init():
        acc_ref[...] = jnp.zeros_like(acc_ref)

    # Per-spatial-tile partial sums, accumulated across the "arbitrary" spatial
    # grid axis.  View-1 rows land in acc[:b_tile], view-2 rows in acc[b_tile:]
    # so the MLPs below run once on the combined 2*B_TILE batch.
    # (Per-tile reduce + scratch accumulate; DMA of the image tiles dominates.)
    acc_ref[:b_tile, :] += jnp.sum(v1_ref[...].astype(jnp.float32), axis=-1)
    acc_ref[b_tile:, :] += jnp.sum(v2_ref[...].astype(jnp.float32), axis=-1)

    @pl.when(s_idx == pl.num_programs(1) - 1)
    def _finalize():
        # Global average pool result for both views: (2*B_TILE, C).
        feats = (acc_ref[...] * inv_spatial).astype(jnp.bfloat16)

        # Encoder projection MLP (BN folded to identity): C -> H1 -> D.
        h = jnp.dot(feats, we1_ref[...], preferred_element_type=jnp.float32)
        h = jnp.maximum(h + be1_ref[...], 0.0).astype(jnp.bfloat16)
        z = jnp.dot(h, we2_ref[...], preferred_element_type=jnp.float32) + be2_ref[...]

        # Predictor MLPhead: D -> D//4 -> D (fused Linear->ReLU->Linear).
        hp = jnp.dot(z.astype(jnp.bfloat16), wp1_ref[...],
                     preferred_element_type=jnp.float32)
        hp = jnp.maximum(hp + bp1_ref[...], 0.0).astype(jnp.bfloat16)
        p = jnp.dot(hp, wp2_ref[...], preferred_element_type=jnp.float32) + bp2_ref[...]

        # F.normalize(p, dim=1) = p / max(||p||, 1e-12) = p * rsqrt(max(||p||^2, 1e-24))
        sq = jnp.sum(p * p, axis=-1, keepdims=True)
        p_n = p * jax.lax.rsqrt(jnp.maximum(sq, jnp.float32(1e-24)))

        z_1, z_2 = z[:b_tile, :], z[b_tile:, :]
        z_2_pred = p_n[:b_tile, :]          # normalize(predictor(z_1))
        z_1_pred = p_n[b_tile:, :]          # normalize(predictor(z_2))

        # loss = -0.5 * ((z_1_pred * z_1).sum(-1) + (z_2_pred * z_2).sum(-1))
        loss = -0.5 * jnp.sum(z_1_pred * z_1 + z_2_pred * z_2, axis=-1)
        loss_ref[...] = loss.reshape(1, b_tile).astype(loss_ref.dtype)


def simsiam_forward(view_1, view_2, params, *, b_tile=None, s_tile=None):
    """view_1, view_2: (B, C, H, W) float arrays. Returns per-sample loss (B,) f32."""
    B, C, H, W = view_1.shape
    S = H * W

    # --- tiling choices ------------------------------------------------------
    if b_tile is None:
        b_tile = min(128, _round_up(B, 8))     # 128-row MXU blocks when batch allows
    b_tile = _round_up(b_tile, 8)
    if s_tile is None:
        s_tile = _choose_s_tile(S)
    assert S % s_tile == 0, "spatial tile must divide H*W"

    B_pad = _round_up(B, b_tile)
    n_b = B_pad // b_tile
    n_s = S // s_tile

    # --- inputs: keep image dtype (bf16 halves the dominant DMA bytes) --------
    v1 = view_1.reshape(B, C, S)
    v2 = view_2.reshape(B, C, S)
    if B_pad != B:
        v1 = jnp.pad(v1, ((0, B_pad - B), (0, 0), (0, 0)))
        v2 = jnp.pad(v2, ((0, B_pad - B), (0, 0), (0, 0)))

    # --- weights: zero-pad feature dims to multiples of 128 (lane axis) -------
    H1 = params["we1"].shape[1]
    D = params["we2"].shape[1]
    P = params["wp1"].shape[1]
    H1p, Dp, Pp = _round_up(H1, 128), _round_up(D, 128), _round_up(P, 128)

    wdt, bdt = jnp.bfloat16, jnp.float32       # bf16 MXU operands, f32 biases/acc
    we1 = _pad_2d(params["we1"], C,   H1p, wdt)
    be1 = _pad_2d(params["be1"], 1,   H1p, bdt)
    we2 = _pad_2d(params["we2"], H1p, Dp,  wdt)
    be2 = _pad_2d(params["be2"], 1,   Dp,  bdt)
    wp1 = _pad_2d(params["wp1"], Dp,  Pp,  wdt)
    bp1 = _pad_2d(params["bp1"], 1,   Pp,  bdt)
    wp2 = _pad_2d(params["wp2"], Pp,  Dp,  wdt)
    bp2 = _pad_2d(params["bp2"], 1,   Dp,  bdt)
    weights = (we1, be1, we2, be2, wp1, bp1, wp2, bp2)

    view_spec = pl.BlockSpec((b_tile, C, s_tile), lambda b, s: (b, 0, s))
    # Grid-invariant weights: full-array blocks with a constant index map
    # (block index never changes -> fetched into VMEM once).
    weight_specs = [pl.BlockSpec(w.shape, lambda b, s: (0, 0)) for w in weights]

    kernel = functools.partial(_simsiam_kernel, b_tile=b_tile,
                               inv_spatial=float(1.0 / S))

    loss2d = pl.pallas_call(
        kernel,
        out_shape=jax.ShapeDtypeStruct((n_b, b_tile), jnp.float32),
        grid_spec=pltpu.PrefetchScalarGridSpec(
            num_scalar_prefetch=0,
            grid=(n_b, n_s),                   # (batch tiles, spatial tiles)
            in_specs=[view_spec, view_spec] + weight_specs,
            out_specs=pl.BlockSpec((1, b_tile), lambda b, s: (b, 0)),
            scratch_shapes=[pltpu.VMEM((2 * b_tile, C), jnp.float32)],
        ),
        compiler_params=pltpu.CompilerParams(
            dimension_semantics=("parallel", "arbitrary"),
            # Explicit scoped-VMEM budget: per-step footprint is only a few MiB
            # (2 views x 2 pipeline buffers x b_tile*C*s_tile + tiny weights),
            # so 32 MiB is safe on v5e / v6e / v7x alike.
            vmem_limit_bytes=32 * 1024 * 1024,
        ),
    )(v1, v2, *weights)

    return loss2d.reshape(-1)[:B]


def init_params(key, c_in, enc_hidden, ssl_feat_dim):
    """Deterministic parameter init (synthetic weights, not a checkpoint)."""
    pred_hidden = ssl_feat_dim // 4    # MLPhead(in=D, hidden=D//4, out=D)
    ks = jax.random.split(key, 4)
    scale = 0.1
    return {
        # encoder projection MLP: C -> enc_hidden -> D
        "we1": scale * jax.random.normal(ks[0], (c_in, enc_hidden), jnp.float32),
        "be1": jnp.zeros((1, enc_hidden), jnp.float32),
        "we2": scale * jax.random.normal(ks[1], (enc_hidden, ssl_feat_dim), jnp.float32),
        "be2": jnp.zeros((1, ssl_feat_dim), jnp.float32),
        # predictor MLPhead: D -> D//4 -> D
        "wp1": scale * jax.random.normal(ks[2], (ssl_feat_dim, pred_hidden), jnp.float32),
        "bp1": jnp.zeros((1, pred_hidden), jnp.float32),
        "wp2": scale * jax.random.normal(ks[3], (pred_hidden, ssl_feat_dim), jnp.float32),
        "bp2": jnp.zeros((1, ssl_feat_dim), jnp.float32),
    }


if __name__ == "__main__":
    key = jax.random.PRNGKey(0)
    k_v1, k_v2, k_params = jax.random.split(key, 3)

    B, C, H, W = 2, 4, 16, 16        # two augmented views of the same batch
    ssl_feat_dim = 32                # config.model.ssl_feature_dim (small)
    enc_hidden = 16                  # small stand-in backbone feature width

    # bf16 views: the image DMA dominates the bytes moved (f32 inputs also work;
    # the kernel accumulates the pool in f32 either way).
    view_1 = jax.random.normal(k_v1, (B, C, H, W), jnp.float32).astype(jnp.bfloat16)
    view_2 = jax.random.normal(k_v2, (B, C, H, W), jnp.float32).astype(jnp.bfloat16)
    params = init_params(k_params, C, enc_hidden, ssl_feat_dim)

    # s_tile=128 -> two spatial grid steps, exercising the accumulator path.
    loss = simsiam_forward(view_1, view_2, params, s_tile=128)
    loss = jax.block_until_ready(loss)
    assert loss.shape == (B,) and loss.dtype == jnp.float32
    print("KERNEL_OK")
</pallas_src>

<mosaic_0001>
module attributes {stable_mosaic.version = 11 : i64} {
  func.func @_simsiam_kernel(%arg0: i32, %arg1: i32, %arg2: memref<8x4x128xbf16, #tpu.memory_space<vmem>>, %arg3: memref<8x4x128xbf16, #tpu.memory_space<vmem>>, %arg4: memref<4x128xbf16, #tpu.memory_space<vmem>>, %arg5: memref<1x128xf32, #tpu.memory_space<vmem>>, %arg6: memref<128x128xbf16, #tpu.memory_space<vmem>>, %arg7: memref<1x128xf32, #tpu.memory_space<vmem>>, %arg8: memref<128x128xbf16, #tpu.memory_space<vmem>>, %arg9: memref<1x128xf32, #tpu.memory_space<vmem>>, %arg10: memref<128x128xbf16, #tpu.memory_space<vmem>>, %arg11: memref<1x128xf32, #tpu.memory_space<vmem>>, %arg12: memref<1x8xf32, #tpu.memory_space<vmem>>, %arg13: memref<16x4xf32, #tpu.memory_space<vmem>>) attributes {dimension_semantics = [#tpu.dimension_semantics<parallel>, #tpu.dimension_semantics<arbitrary>], iteration_bounds = array<i64: 1, 2>, scalar_prefetch = 0 : i64, scratch_operands = 1 : i64, tpu.core_type = #tpu.core_type<tc>, window_params = [{transform_indices = @transform_0, window_bounds = array<i64: 8, 4, 128>}, {transform_indices = @transform_1, window_bounds = array<i64: 8, 4, 128>}, {pipeline_mode = #tpu.pipeline_mode<synchronous>, transform_indices = @transform_2, window_bounds = array<i64: 4, 128>}, {pipeline_mode = #tpu.pipeline_mode<synchronous>, transform_indices = @transform_3, window_bounds = array<i64: 1, 128>}, {pipeline_mode = #tpu.pipeline_mode<synchronous>, transform_indices = @transform_4, window_bounds = array<i64: 128, 128>}, {pipeline_mode = #tpu.pipeline_mode<synchronous>, transform_indices = @transform_5, window_bounds = array<i64: 1, 128>}, {pipeline_mode = #tpu.pipeline_mode<synchronous>, transform_indices = @transform_6, window_bounds = array<i64: 128, 128>}, {pipeline_mode = #tpu.pipeline_mode<synchronous>, transform_indices = @transform_7, window_bounds = array<i64: 1, 128>}, {pipeline_mode = #tpu.pipeline_mode<synchronous>, transform_indices = @transform_8, window_bounds = array<i64: 128, 128>}, {pipeline_mode = #tpu.pipeline_mode<synchronous>, transform_indices = @transform_9, window_bounds = array<i64: 1, 128>}, {transform_indices = @transform_10, window_bounds = array<i64: 1, 8>}]} {
    %c0_i32 = arith.constant 0 : i32
    %0 = arith.cmpi eq, %arg1, %c0_i32 : i32
    %1 = arith.extui %0 : i1 to i32
    %c0_i32_0 = arith.constant 0 : i32
    %2 = arith.cmpi ne, %1, %c0_i32_0 : i32
    scf.if %2 {
      %cst_15 = arith.constant 0.000000e+00 : f32
      %18 = vector.broadcast %cst_15 : f32 to vector<16x4xf32>
      %c0_16 = arith.constant 0 : index
      %c0_17 = arith.constant 0 : index
      %19 = vector.load %arg13[%c0_16, %c0_17] : memref<16x4xf32, #tpu.memory_space<vmem>>, vector<16x4xf32>
      tpu.vector_store %arg13[%c0_16, %c0_17], %18 {strides = array<i32>} : memref<16x4xf32, #tpu.memory_space<vmem>>, vector<16x4xf32>,
    } else {
    }
    %c0 = arith.constant 0 : index
    %c0_1 = arith.constant 0 : index
    %3 = vector.load %arg13[%c0, %c0_1] : memref<16x4xf32, #tpu.memory_space<vmem>>, vector<8x4xf32>
    %c0_2 = arith.constant 0 : index
    %c0_3 = arith.constant 0 : index
    %c0_4 = arith.constant 0 : index
    %4 = vector.load %arg2[%c0_2, %c0_3, %c0_4] : memref<8x4x128xbf16, #tpu.memory_space<vmem>>, vector<8x4x128xbf16>
    %5 = arith.extf %4 : vector<8x4x128xbf16> to vector<8x4x128xf32>
    %cst = arith.constant dense<0.000000e+00> : vector<8x4xf32>
    %6 = vector.multi_reduction <add>, %5, %cst [2] : vector<8x4x128xf32> to vector<8x4xf32>
    %7 = arith.addf %3, %6 : vector<8x4xf32>
    %c0_5 = arith.constant 0 : index
    %c0_6 = arith.constant 0 : index
    %8 = vector.load %arg13[%c0_5, %c0_6] : memref<16x4xf32, #tpu.memory_space<vmem>>, vector<8x4xf32>
    tpu.vector_store %arg13[%c0_5, %c0_6], %7 {strides = array<i32>} : memref<16x4xf32, #tpu.memory_space<vmem>>, vector<8x4xf32>,
    %c8 = arith.constant 8 : index
    %c0_7 = arith.constant 0 : index
    %9 = vector.load %arg13[%c8, %c0_7] : memref<16x4xf32, #tpu.memory_space<vmem>>, vector<8x4xf32>
    %c0_8 = arith.constant 0 : index
    %c0_9 = arith.constant 0 : index
    %c0_10 = arith.constant 0 : index
    %10 = vector.load %arg3[%c0_8, %c0_9, %c0_10] : memref<8x4x128xbf16, #tpu.memory_space<vmem>>, vector<8x4x128xbf16>
    %11 = arith.extf %10 : vector<8x4x128xbf16> to vector<8x4x128xf32>
    %cst_11 = arith.constant dense<0.000000e+00> : vector<8x4xf32>
    %12 = vector.multi_reduction <add>, %11, %cst_11 [2] : vector<8x4x128xf32> to vector<8x4xf32>
    %13 = arith.addf %9, %12 : vector<8x4xf32>
    %c8_12 = arith.constant 8 : index
    %c0_13 = arith.constant 0 : index
    %14 = vector.load %arg13[%c8_12, %c0_13] : memref<16x4xf32, #tpu.memory_space<vmem>>, vector<8x4xf32>
    tpu.vector_store %arg13[%c8_12, %c0_13], %13 {strides = array<i32>} : memref<16x4xf32, #tpu.memory_space<vmem>>, vector<8x4xf32>,
    %c1_i32 = arith.constant 1 : i32
    %15 = arith.cmpi eq, %arg1, %c1_i32 : i32
    %16 = arith.extui %15 : i1 to i32
    %c0_i32_14 = arith.constant 0 : i32
    %17 = arith.cmpi ne, %16, %c0_i32_14 : i32
    scf.if %17 {
      %c0_15 = arith.constant 0 : index
      %c0_16 = arith.constant 0 : index
      %18 = vector.load %arg13[%c0_15, %c0_16] : memref<16x4xf32, #tpu.memory_space<vmem>>, vector<16x4xf32>
      %cst_17 = arith.constant 3.906250e-03 : f32
      %19 = vector.broadcast %cst_17 : f32 to vector<16x4xf32>
      %20 = arith.mulf %18, %19 : vector<16x4xf32>
      %21 = arith.truncf %20 : vector<16x4xf32> to vector<16x4xbf16>
      %c0_18 = arith.constant 0 : index
      %c0_19 = arith.constant 0 : index
      %22 = vector.load %arg4[%c0_18, %c0_19] : memref<4x128xbf16, #tpu.memory_space<vmem>>, vector<4x128xbf16>
      %cst_20 = arith.constant dense<0.000000e+00> : vector<16x128xf32>
      %23 = tpu.matmul %21, %22, %cst_20 {dimension_numbers = #tpu.dot_dimension_numbers<[1], [0], [0], [1], [0, 0, 1, 1], [], []>} : vector<16x4xbf16>, vector<4x128xbf16>, vector<16x128xf32> -> vector<16x128xf32>
      %c0_21 = arith.constant 0 : index
      %c0_22 = arith.constant 0 : index
      %24 = vector.load %arg5[%c0_21, %c0_22] : memref<1x128xf32, #tpu.memory_space<vmem>>, vector<1x128xf32>
      %25 = vector.broadcast %24 : vector<1x128xf32> to vector<16x128xf32>
      %26 = arith.addf %23, %25 : vector<16x128xf32>
      %cst_23 = arith.constant 0.000000e+00 : f32
      %27 = vector.broadcast %cst_23 : f32 to vector<16x128xf32>
      %28 = arith.maximumf %26, %27 : vector<16x128xf32>
      %29 = arith.truncf %28 : vector<16x128xf32> to vector<16x128xbf16>
      %c0_24 = arith.constant 0 : index
      %c0_25 = arith.constant 0 : index
      %30 = vector.load %arg6[%c0_24, %c0_25] : memref<128x128xbf16, #tpu.memory_space<vmem>>, vector<128x128xbf16>
      %cst_26 = arith.constant dense<0.000000e+00> : vector<16x128xf32>
      %31 = tpu.matmul %29, %30, %cst_26 {dimension_numbers = #tpu.dot_dimension_numbers<[1], [0], [0], [1], [0, 0, 1, 1], [], []>} : vector<16x128xbf16>, vector<128x128xbf16>, vector<16x128xf32> -> vector<16x128xf32>
      %c0_27 = arith.constant 0 : index
      %c0_28 = arith.constant 0 : index
      %32 = vector.load %arg7[%c0_27, %c0_28] : memref<1x128xf32, #tpu.memory_space<vmem>>, vector<1x128xf32>
      %33 = vector.broadcast %32 : vector<1x128xf32> to vector<16x128xf32>
      %34 = arith.addf %31, %33 : vector<16x128xf32>
      %35 = arith.truncf %34 : vector<16x128xf32> to vector<16x128xbf16>
      %c0_29 = arith.constant 0 : index
      %c0_30 = arith.constant 0 : index
      %36 = vector.load %arg8[%c0_29, %c0_30] : memref<128x128xbf16, #tpu.memory_space<vmem>>, vector<128x128xbf16>
      %cst_31 = arith.constant dense<0.000000e+00> : vector<16x128xf32>
      %37 = tpu.matmul %35, %36, %cst_31 {dimension_numbers = #tpu.dot_dimension_numbers<[1], [0], [0], [1], [0, 0, 1, 1], [], []>} : vector<16x128xbf16>, vector<128x128xbf16>, vector<16x128xf32> -> vector<16x128xf32>
      %c0_32 = arith.constant 0 : index
      %c0_33 = arith.constant 0 : index
      %38 = vector.load %arg9[%c0_32, %c0_33] : memref<1x128xf32, #tpu.memory_space<vmem>>, vector<1x128xf32>
      %39 = vector.broadcast %38 : vector<1x128xf32> to vector<16x128xf32>
      %40 = arith.addf %37, %39 : vector<16x128xf32>
      %cst_34 = arith.constant 0.000000e+00 : f32
      %41 = vector.broadcast %cst_34 : f32 to vector<16x128xf32>
      %42 = arith.maximumf %40, %41 : vector<16x128xf32>
      %43 = arith.truncf %42 : vector<16x128xf32> to vector<16x128xbf16>
      %c0_35 = arith.constant 0 : index
      %c0_36 = arith.constant 0 : index
      %44 = vector.load %arg10[%c0_35, %c0_36] : memref<128x128xbf16, #tpu.memory_space<vmem>>, vector<128x128xbf16>
      %cst_37 = arith.constant dense<0.000000e+00> : vector<16x128xf32>
      %45 = tpu.matmul %43, %44, %cst_37 {dimension_numbers = #tpu.dot_dimension_numbers<[1], [0], [0], [1], [0, 0, 1, 1], [], []>} : vector<16x128xbf16>, vector<128x128xbf16>, vector<16x128xf32> -> vector<16x128xf32>
      %c0_38 = arith.constant 0 : index
      %c0_39 = arith.constant 0 : index
      %46 = vector.load %arg11[%c0_38, %c0_39] : memref<1x128xf32, #tpu.memory_space<vmem>>, vector<1x128xf32>
      %47 = vector.broadcast %46 : vector<1x128xf32> to vector<16x128xf32>
      %48 = arith.addf %45, %47 : vector<16x128xf32>
      %49 = arith.mulf %48, %48 : vector<16x128xf32>
      %cst_40 = arith.constant dense<0.000000e+00> : vector<16xf32>
      %50 = vector.multi_reduction <add>, %49, %cst_40 [1] : vector<16x128xf32> to vector<16xf32>
      %51 = vector.shape_cast %50 : vector<16xf32> to vector<16x1xf32>
      %cst_41 = arith.constant 1.000000e-24 : f32
      %52 = vector.broadcast %cst_41 : f32 to vector<16x1xf32>
      %53 = arith.maximumf %51, %52 : vector<16x1xf32>
      %54 = math.rsqrt %53 : vector<16x1xf32>
      %55 = vector.broadcast %54 : vector<16x1xf32> to vector<16x128xf32>
      %56 = arith.mulf %48, %55 : vector<16x128xf32>
      %57 = vector.extract_strided_slice %34 {offsets = [0, 0], sizes = [8, 128], strides = [1, 1]} : vector<16x128xf32> to vector<8x128xf32>
      %58 = vector.extract_strided_slice %34 {offsets = [8, 0], sizes = [8, 128], strides = [1, 1]} : vector<16x128xf32> to vector<8x128xf32>
      %59 = vector.extract_strided_slice %56 {offsets = [0, 0], sizes = [8, 128], strides = [1, 1]} : vector<16x128xf32> to vector<8x128xf32>
      %60 = vector.extract_strided_slice %56 {offsets = [8, 0], sizes = [8, 128], strides = [1, 1]} : vector<16x128xf32> to vector<8x128xf32>
      %61 = arith.mulf %60, %57 : vector<8x128xf32>
      %62 = arith.mulf %59, %58 : vector<8x128xf32>
      %63 = arith.addf %61, %62 : vector<8x128xf32>
      %cst_42 = arith.constant dense<0.000000e+00> : vector<8xf32>
      %64 = vector.multi_reduction <add>, %63, %cst_42 [1] : vector<8x128xf32> to vector<8xf32>
      %cst_43 = arith.constant -5.000000e-01 : f32
      %65 = vector.broadcast %cst_43 : f32 to vector<8xf32>
      %66 = arith.mulf %65, %64 : vector<8xf32>
      %67 = vector.shape_cast %66 : vector<8xf32> to vector<1x8xf32>
      %c0_44 = arith.constant 0 : index
      %c0_45 = arith.constant 0 : index
      %68 = vector.load %arg12[%c0_44, %c0_45] : memref<1x8xf32, #tpu.memory_space<vmem>>, vector<1x8xf32>
      tpu.vector_store %arg12[%c0_44, %c0_45], %67 {strides = array<i32>} : memref<1x8xf32, #tpu.memory_space<vmem>>, vector<1x8xf32>,
    } else {
    }
    return
  }
  func.func @transform_0(%arg0: i32, %arg1: i32) -> (i32, i32, i32) {
    %c0_i32 = arith.constant 0 : i32
    %c0_i32_0 = arith.constant 0 : i32
    return %arg0, %c0_i32, %arg1 : i32, i32, i32
  }
  func.func @transform_1(%arg0: i32, %arg1: i32) -> (i32, i32, i32) {
    %c0_i32 = arith.constant 0 : i32
    %c0_i32_0 = arith.constant 0 : i32
    return %arg0, %c0_i32, %arg1 : i32, i32, i32
  }
  func.func @transform_2(%arg0: i32, %arg1: i32) -> (i32, i32) {
    %c0_i32 = arith.constant 0 : i32
    %c0_i32_0 = arith.constant 0 : i32
    %c0_i32_1 = arith.constant 0 : i32
    return %c0_i32, %c0_i32_0 : i32, i32
  }
  func.func @transform_3(%arg0: i32, %arg1: i32) -> (i32, i32) {
    %c0_i32 = arith.constant 0 : i32
    %c0_i32_0 = arith.constant 0 : i32
    %c0_i32_1 = arith.constant 0 : i32
    return %c0_i32, %c0_i32_0 : i32, i32
  }
  func.func @transform_4(%arg0: i32, %arg1: i32) -> (i32, i32) {
    %c0_i32 = arith.constant 0 : i32
    %c0_i32_0 = arith.constant 0 : i32
    %c0_i32_1 = arith.constant 0 : i32
    return %c0_i32, %c0_i32_0 : i32, i32
  }
  func.func @transform_5(%arg0: i32, %arg1: i32) -> (i32, i32) {
    %c0_i32 = arith.constant 0 : i32
    %c0_i32_0 = arith.constant 0 : i32
    %c0_i32_1 = arith.constant 0 : i32
    return %c0_i32, %c0_i32_0 : i32, i32
  }
  func.func @transform_6(%arg0: i32, %arg1: i32) -> (i32, i32) {
    %c0_i32 = arith.constant 0 : i32
    %c0_i32_0 = arith.constant 0 : i32
    %c0_i32_1 = arith.constant 0 : i32
    return %c0_i32, %c0_i32_0 : i32, i32
  }
  func.func @transform_7(%arg0: i32, %arg1: i32) -> (i32, i32) {
    %c0_i32 = arith.constant 0 : i32
    %c0_i32_0 = arith.constant 0 : i32
    %c0_i32_1 = arith.constant 0 : i32
    return %c0_i32, %c0_i32_0 : i32, i32
  }
  func.func @transform_8(%arg0: i32, %arg1: i32) -> (i32, i32) {
    %c0_i32 = arith.constant 0 : i32
    %c0_i32_0 = arith.constant 0 : i32
    %c0_i32_1 = arith.constant 0 : i32
    return %c0_i32, %c0_i32_0 : i32, i32
  }
  func.func @transform_9(%arg0: i32, %arg1: i32) -> (i32, i32) {
    %c0_i32 = arith.constant 0 : i32
    %c0_i32_0 = arith.constant 0 : i32
    %c0_i32_1 = arith.constant 0 : i32
    return %c0_i32, %c0_i32_0 : i32, i32
  }
  func.func @transform_10(%arg0: i32, %arg1: i32) -> (i32, i32) {
    %c0_i32 = arith.constant 0 : i32
    %c0_i32_0 = arith.constant 0 : i32
    return %arg0, %c0_i32 : i32, i32
  }
}

</mosaic_0001>

<bundles_post_ra>
// kernel: tpu_custom_call.1
= control target key start
LH: loop header
LB: loop body
LE: loop exit
PB: predicated region body
PF: predicated region fallthrough
CT: control target
= control target key end

     0   :  { %s2240_s0 = inlined_call_operand.hbm [shape: bf16[8,4,256], index: 0, kind: input, shape index: {}]   ;;  %s2241_s1 = inlined_call_operand.hbm [shape: bf16[8,4,256], index: 1, kind: input, shape index: {}]   ;;  %s2242_s2 = inlined_call_operand.vmem [shape: bf16[4,128], index: 2, kind: input, shape index: {}]   ;;  %s2243_s3 = inlined_call_operand.vmem [shape: f32[1,128], index: 3, kind: input, shape index: {}]   ;;  %s2244_s4 = inlined_call_operand.hbm [shape: bf16[128,128], index: 4, kind: input, shape index: {}]   ;;  %s2245_s5 = inlined_call_operand.vmem [shape: f32[1,128], index: 5, kind: input, shape index: {}]   ;;  %s2246_s6 = inlined_call_operand.hbm [shape: bf16[128,128], index: 6, kind: input, shape index: {}]   ;;  %s2247_s7 = inlined_call_operand.vmem [shape: f32[1,128], index: 7, kind: input, shape index: {}]   ;;  %s2248_s8 = inlined_call_operand.hbm [shape: bf16[128,128], index: 8, kind: input, shape index: {}]   ;;  %s2249_s9 = inlined_call_operand.vmem [shape: f32[1,128], index: 9, kind: input, shape index: {}]   ;;  %s2250_s10 = inlined_call_operand.hbm [shape: f32[1,8], index: 10, kind: output, shape index: {}]  }
   0x1   :  { %2256 = sst [smem:[#allocation18_spill]] %s2240_s0 }
   0x2   :  { %2257 = sst [smem:[#allocation19_spill]] %s2244_s4 }
   0x3   :  { %2258 = sst [smem:[#allocation20_spill]] %s2245_s5 }
   0x4   :  { %2259 = sst [smem:[#allocation21_spill]] %s2246_s6 }
   0x5   :  { %2260 = sst [smem:[#allocation22_spill]] %s2247_s7 }
   0x6   :  { %2261 = sst [smem:[#allocation23_spill]] %s2249_s9 }
   0x7   :  { %2262 = sst [smem:[#allocation24_spill]] %s2250_s10 }
   0x8   :  { %15 = vsyncpa [#allocation4], 0 }
   0x9   :  { %17 = vsyncpa [#allocation4 + $0x1], 0 }
   0xa   :  { %18 = vsyncpa [#allocation7], 0 }
   0xb   :  { %20 = vsyncpa [#allocation7 + $0x1], 0 }
   0xc   :  { %21 = vsyncpa [#allocation10], 0 }
   0xd   :  { %22 = vsyncpa [#allocation5], 0  ;;  %s1821_s13 = smov 0   ;;  %s1823_s14 = smov 0  }
   0xe   :  { %s1825_s15 = smov 0   ;;  %s1827_s16 = smov 0  }
   0xf   :  { %s1829_s17 = smov 0   ;;  %s1831_s18 = smov 0  }
  0x10 LB: > { %s1850_s19 = sadd.s32 4294967295, %s1751_s18   ;;  %p56_p0 = scmp.ne.s32.totalorder %s1739_s15, %s1735_s14  ;;  %s1751_s18 = sphi %s1831_s18, %s28_s18   ;;  %s1747_s17 = sphi %s1829_s17, %s2287_s17   ;;  %s1743_s16 = sphi %s1827_s16, %s2286_s16   ;;  %s1739_s15 = sphi %s1825_s15, %s2285_s15   ;;  %s1735_s14 = sphi %s1823_s14, %s2284_s14   ;;  %s1731_s13 = sphi %s1821_s13, %s2283_s13  }
  0x11   : > { %p57_p1 = scmp.eq.s32.totalorder %s1751_s18, 0  ;;  %p62_p2 = scmp.ne.s32.totalorder %s1735_s14, %s1731_s13 }
  0x12   : > { %p2251_p3 = scmp.eq.s32.totalorder %s1850_s19, 0  ;;  %p1237_p5 = scmp.ge.s32.totalorder %s1751_s18, 1 }
  0x13   : > { %p58_p4 = por %p57_p1, %p56_p0  ;;  %p295_p7 = scmp.lt.s32.totalorder %s1751_s18, 3 }
  0x14   : > { %p1861_p6 = por %p2251_p3, %p62_p2  ;;  %s1753_s23 = smov [#allocation8]  }
  0x15   : > { %p1866_p8 = pnand %p1237_p5, %p295_p7  ;;  %s313_s24 = sshll.u32 %s1753_s23, 4  ;;  %s1870_s24 = int_to_ptr.vmem [resolvable:$true] %s313_s24 }
  0x16   : > { %s2263_s21 = scalar_select %p1861_p6, 1, 0 }
  0x17   : > { %s2264_s22 = scalar_select %p1866_p8, 1, 0 }
  0x18   : > { %p1402_p9 = pneg %p1866_p8  ;;  %p1422_p10 = scmp.lt.s32.totalorder %s1751_s18, 2 }
  0x19   : > { %s1754_s27 = smov [#allocation9]   ;;  %s2267_s4 = sld [smem:[#allocation19_spill]] }
  0x1a   : > { %p1877_p11 = pnand %p1402_p9, %p2251_p3  ;;  %p1881_p12 = pnand %p1422_p10, %p58_p4 }
  0x1b   : > { %s329_s28 = sshll.u32 %s1754_s27, 4  ;;  %s1885_s28 = int_to_ptr.vmem [resolvable:$true] %s329_s28 }
  0x1c   : > { %s2266_s26 = scalar_select %p1881_p12, 1, 0 }
  0x1d   : > { %p1895_p0 = pneg %p1877_p11 }
  0x1f   : > { %s1515_s11 = scalar_lea.hbm %s2267_s4, 1024 }
  0x20   : > { %p1516_p13 = scmp.ne.s32.totalorder %s2267_s4, %s1515_s11  ;;  %p1522_p4 = scmp.lt.u32.totalorder %s1515_s11, %s2267_s4 }
  0x22   : > { %p1518_p1 = pnand %p1895_p0, %p1516_p13 }
  0x24   : > { %p1519_p2 = pneg %p1518_p1 }
  0x26   : > { %p1524_p5 = pnand %p1522_p4, %p1519_p2 }
  0x28   : > { %1527 = shalt.err (!%p1524_p5)
}
  0x29   : > { %s1528_s29 = scalar_lea.vmem %s1870_s24, 1024  ;;  %p1536_p3 = scmp.lt.s32.totalorder %s1870_s24, %s1870_s24 }
  0x2a   : > { %p1529_p7 = scmp.ne.s32.totalorder %s1870_s24, %s1528_s29  ;;  %p1537_p6 = scmp.lt.s32.totalorder %s1528_s29, %s1528_s29 }
  0x2c   : > { %p1531_p9 = pnand %p1529_p7, %p1895_p0  ;;  %p1538_p13 = por %p1537_p6, %p1536_p3 }
  0x2e   : > { %p1532_p10 = pneg %p1531_p9 }
  0x30   : > { %p1539_p1 = pnand %p1538_p13, %p1532_p10 }
  0x32   : > { %1542 = shalt.err (!%p1539_p1)
}
  0x33   : > { %s1755_s30 = smov 64   ;;  %s1756_s20 = smov 4  }
  0x34   : > { %1405 = dma.hbm_to_vmem [thread:$0]  (!%p1877_p11), %s2267_s4, 1024, %s1870_s24, [#allocation7], %s1755_s30, %s1755_s30, %s1756_s20  }
  0x35   : > { %s2269_s6 = sld [smem:[#allocation21_spill]] }
  0x3b   : > { %s1543_s29 = scalar_lea.hbm %s2269_s6, 1024 }
  0x3c   : > { %p1544_p3 = scmp.ne.s32.totalorder %s2269_s6, %s1543_s29  ;;  %p1550_p4 = scmp.lt.u32.totalorder %s1543_s29, %s2269_s6 }
  0x3e   : > { %p1546_p6 = pnand %p1544_p3, %p1895_p0 }
  0x40   : > { %p1547_p2 = pneg %p1546_p6 }
  0x42   : > { %p1552_p5 = pnand %p1550_p4, %p1547_p2 }
  0x44   : > { %1555 = shalt.err (!%p1552_p5)
}
  0x45   : > { %s1556_s24 = scalar_lea.vmem %s1885_s28, 1024  ;;  %p1564_p13 = scmp.lt.s32.totalorder %s1885_s28, %s1885_s28 }
  0x46   : > { %p1557_p7 = scmp.ne.s32.totalorder %s1885_s28, %s1556_s24  ;;  %p1565_p1 = scmp.lt.s32.totalorder %s1556_s24, %s1556_s24 }
  0x48   : > { %p1559_p9 = pnand %p1557_p7, %p1895_p0  ;;  %p1566_p3 = por %p1565_p1, %p1564_p13 }
  0x4a   : > { %p1560_p10 = pneg %p1559_p9 }
  0x4c   : > { %p1567_p6 = pnand %p1566_p3, %p1560_p10 }
  0x4e   : > { %1570 = shalt.err (!%p1567_p6)
}
  0x4f   : > { %1408 = dma.hbm_to_vmem [thread:$0]  (!%p1877_p11), %s2269_s6, 1024, %s1885_s28, [#allocation10], %s1755_s30, %s1755_s30, %s1756_s20  }
  0x50   : > { %s1757_s9 = smov [#allocation11]   ;;  %s1571_s13 = scalar_lea.hbm %s2248_s8, 1024 }
  0x51   : > { %s345_s10 = sshll.u32 %s1757_s9, 4  ;;  %p1572_p2 = scmp.ne.s32.totalorder %s2248_s8, %s1571_s13  ;;  %s346_s10 = int_to_ptr.vmem [resolvable:$true] %s345_s10 }
  0x52   : > { %p1578_p7 = scmp.lt.u32.totalorder %s1571_s13, %s2248_s8 }
  0x53   : > { %p1574_p4 = pnand %p1572_p2, %p1895_p0 }
  0x55   : > { %p1575_p5 = pneg %p1574_p4 }
  0x57   : > { %p1580_p9 = pnand %p1578_p7, %p1575_p5 }
  0x59   : > { %1583 = shalt.err (!%p1580_p9)
}
  0x5a   : > { %s1584_s28 = scalar_lea.vmem %s346_s10, 1024  ;;  %p1592_p3 = scmp.lt.s32.totalorder %s346_s10, %s346_s10 }
  0x5b   : > { %p1585_p10 = scmp.ne.s32.totalorder %s346_s10, %s1584_s28  ;;  %p1593_p6 = scmp.lt.s32.totalorder %s1584_s28, %s1584_s28 }
  0x5d   : > { %p1587_p13 = pnand %p1585_p10, %p1895_p0  ;;  %p1594_p8 = por %p1593_p6, %p1592_p3 }
  0x5f   : > { %p1588_p1 = pneg %p1587_p13 }
  0x61   : > { %p1595_p12 = pnand %p1594_p8, %p1588_p1 }
  0x63   : > { %1598 = shalt.err (!%p1595_p12)
}
  0x64   : > { %1411 = dma.hbm_to_vmem [thread:$0]  (!%p1877_p11), %s2248_s8, 1024, %s346_s10, [#allocation10], %s1755_s30, %s1755_s30, %s1756_s20  }
  0x65   : > { %s37_s23 = sadd.s32 1, %s1747_s17  ;;  %s362_s7 = sand.u32 1, %s1739_s15  }
  0x66   : > { %p38_p8 = scmp.ge.s32.totalorder %s37_s23, 2  ;;  %s1968_s25 = sshll.u32 %s362_s7, 4 }
  0x67   : > { %s1243_s9 = sshll.u32 %s1747_s17, 5  ;;  %s2270_s0 = sld [smem:[#allocation18_spill]] }
  0x68   : > { %s2289_s23 = smov (%p38_p8, %s37_s23), 0  ;;  %s366_s10 = scalar_lea.vmem [#allocation3], %s1968_s25 }
  0x69   : > { %s45_s20 = ssub.s32 %s1747_s17, %s2289_s23  ;;  %s375_s27 = sshll.u32 %s366_s10, 4  ;;  %s1983_s27 = int_to_ptr.vmem [resolvable:$true] %s375_s27 }
  0x6a   : > { %p47_p11 = scmp.eq.s32.totalorder %s45_s20, 0  ;;  %s2271_s29 = sadd.s32 1, %s1739_s15 }
  0x6b   : > { %s1990_s28 = scalar_lea.sflag [#allocation4], %s362_s7  ;;  %p2272_p0 = scmp.ne.s32.totalorder %s2266_s26, 0 }
  0x6c   : > { %s1988_s24 = scalar_select %p47_p11, %s1739_s15, %s2271_s29  }
  0x6d   : > { %s1978_s13 = scalar_lea.hbm %s2270_s0, %s1243_s9  ;;  %p1601_p2 = pneg %p2272_p0 }
  0x6e   : > { %s1599_s4 = scalar_lea.hbm %s1978_s13, 256  ;;  %s1604_s12 = scalar_lea.hbm %s2270_s0, 512 }
  0x6f   : > { %p1600_p12 = scmp.ne.s32.totalorder %s1978_s13, %s1599_s4  ;;  %p1605_p7 = scmp.lt.u32.totalorder %s1978_s13, %s2270_s0 }
  0x70   : > { %p1606_p9 = scmp.lt.u32.totalorder %s1604_s12, %s1599_s4  ;;  %p1608_p13 = scmp.lt.u32.totalorder %s1599_s4, %s1978_s13 }
  0x71   : > { %p1602_p4 = pnand %p1601_p2, %p1600_p12 }
  0x72   : > { %p1607_p10 = por %p1606_p9, %p1605_p7 }
  0x73   : > { %p1603_p5 = pneg %p1602_p4 }
  0x74   : > { %p1609_p1 = por %p1608_p13, %p1607_p10 }
  0x76   : > { %p1610_p3 = pnand %p1609_p1, %p1603_p5 }
  0x78   : > { %1613 = shalt.err (!%p1610_p3)
}
  0x79   : > { %s1614_s7 = scalar_lea.vmem %s1983_s27, 256  ;;  %s1758_s29 = smov [#allocation3]  }
  0x7a   : > { %p1615_p6 = scmp.ne.s32.totalorder %s1983_s27, %s1614_s7  ;;  %s1619_s5 = sshll.u32 %s1758_s29, 4  ;;  %s1620_s5 = int_to_ptr.vmem [resolvable:$false] %s1619_s5 }
  0x7b   : > { %s1621_s11 = scalar_lea.vmem %s1620_s5, 512  ;;  %p1622_p12 = scmp.lt.s32.totalorder %s1983_s27, %s1620_s5 }
  0x7c   : > { %p1617_p8 = pnand %p1615_p6, %p1601_p2  ;;  %p1623_p4 = scmp.lt.s32.totalorder %s1621_s11, %s1614_s7 }
  0x7e   : > { %p1618_p11 = pneg %p1617_p8  ;;  %p1624_p7 = por %p1623_p4, %p1622_p12 }
  0x80   : > { %p1625_p9 = pnand %p1624_p7, %p1618_p11 }
  0x82   : > { %1628 = shalt.err (!%p1625_p9)
}
  0x83   : > { %s1759_s4 = smov 32   ;;  %s1760_s12 = smov 2  }
  0x84   : > { %1415 = dma.hbm_to_vmem [thread:$0]  (!%p2272_p0), %s1978_s13, 256, %s1983_s27, %s1990_s28, %s1755_s30, %s1759_s4, %s1760_s12  }
  0x85   : > { %s2026_s7 = scalar_lea.hbm %s2241_s1, %s1243_s9  ;;  %s389_s29 = scalar_lea.vmem [#allocation6], %s1968_s25 }
  0x86   : > { %s398_s5 = sshll.u32 %s389_s29, 4  ;;  %s385_s11 = sand.u32 1, %s1751_s18   ;;  %s2030_s5 = int_to_ptr.vmem [resolvable:$true] %s398_s5 }
  0x87   : > { %s2032_s0 = scalar_lea.sflag [#allocation7], %s385_s11  ;;  %s1629_s6 = scalar_lea.hbm %s2026_s7, 256 }
  0x88   : > { %p1630_p5 = scmp.ne.s32.totalorder %s2026_s7, %s1629_s6  ;;  %s1634_s27 = scalar_lea.hbm %s2241_s1, 512 }
  0x89   : > { %p1635_p1 = scmp.lt.u32.totalorder %s2026_s7, %s2241_s1  ;;  %p1636_p3 = scmp.lt.u32.totalorder %s1634_s27, %s1629_s6 }
  0x8a   : > { %p1632_p10 = pnand %p1630_p5, %p1601_p2  ;;  %p1638_p8 = scmp.lt.u32.totalorder %s1629_s6, %s2026_s7 }
  0x8b   : > { %p1637_p6 = por %p1636_p3, %p1635_p1 }
  0x8c   : > { %p1633_p13 = pneg %p1632_p10 }
  0x8d   : > { %p1639_p11 = por %p1638_p8, %p1637_p6 }
  0x8f   : > { %p1640_p12 = pnand %p1639_p11, %p1633_p13 }
  0x91   : > { %1643 = shalt.err (!%p1640_p12)
}
  0x92   : > { %s1644_s25 = scalar_lea.vmem %s2030_s5, 256  ;;  %s1761_s10 = smov [#allocation6]  }
  0x93   : > { %p1645_p4 = scmp.ne.s32.totalorder %s2030_s5, %s1644_s25  ;;  %s1649_s29 = sshll.u32 %s1761_s10, 4  ;;  %s1650_s29 = int_to_ptr.vmem [resolvable:$false] %s1649_s29 }
  0x94   : > { %s1651_s11 = scalar_lea.vmem %s1650_s29, 512  ;;  %p1652_p5 = scmp.lt.s32.totalorder %s2030_s5, %s1650_s29 }
  0x95   : > { %p1647_p7 = pnand %p1645_p4, %p1601_p2  ;;  %p1653_p10 = scmp.lt.s32.totalorder %s1651_s11, %s1644_s25 }
  0x97   : > { %p1648_p9 = pneg %p1647_p7  ;;  %p1654_p1 = por %p1653_p10, %p1652_p5 }
  0x99   : > { %p1655_p3 = pnand %p1654_p1, %p1648_p9 }
  0x9b   : > { %1658 = shalt.err (!%p1655_p3)
}
  0x9c   : > { %1418 = dma.hbm_to_vmem [thread:$0]  (!%p2272_p0), %s2026_s7, 256, %s2030_s5, %s2032_s0, %s1755_s30, %s1759_s4, %s1760_s12  }
  0x9d   : > { %p2273_p2 = scmp.ne.s32.totalorder %s2264_s22, 0 }
  0x9e   : > { %s412_s6 = sand.u32 (!%p2273_p2), 1, %s1735_s14   ;;  %p2274_p13 = scmp.ne.s32.totalorder (!%p2273_p2), %s2263_s21, 0 }
  0x9f   : > { %410 = sbr.rel (%p2273_p2) target bundleno = 1594 (0x63a), region = 60  ;;  %s1247_s13 = sshll.u32 (!%p2273_p2), %s412_s6, 4 }
  0xa0   : > { %s413_s9 = scalar_lea.sflag (!%p2273_p2), [#allocation4], %s412_s6  ;;  %s2064_s27 = scalar_lea.vmem (!%p2273_p2), [#allocation3], %s1247_s13 }
  0xa6   : > { %1710 = dma.done.wait (%p2274_p13), %s413_s9, 256  }
  0xa7   : > { %1712 = vsyncadd (%p2274_p13), %s413_s9, 4294967040  ;;  %s421_s26 = sand.u32 1, %s1850_s19   ;;  %s2071_s0 = scalar_lea.vmem [#allocation6], %s1247_s13 }
  0xa8   : > { %s422_s28 = scalar_lea.sflag [#allocation7], %s421_s26 }
  0xa9   : > { %1714 = dma.done.wait (%p2274_p13), %s422_s28, 256  }
  0xaa   : > { %1716 = vsyncadd (%p2274_p13), %s422_s28, 4294967040  ;;  %p2275_p0 = scmp.eq.s32.totalorder %s1850_s19, 0 }
  0xac   : > { %1718 = dma.done.wait (%p2275_p0), [#allocation7], 1024   ;;  %p2276_p6 = pmov %p2275_p0 }
  0xad   : > { %p2277_p8 = pmov %p2275_p0 }
  0xae   : > { %1720 = vsyncadd (%p2276_p6), [#allocation7], 4294966272 }
  0xaf   : > { %1722 = dma.done.wait (%p2277_p8), [#allocation10], 2048   ;;  %p2278_p11 = pmov %p2275_p0 }
  0xb0   : > { %p1252_p12 = scmp.ne.s32.totalorder %s1743_s16, 0 }
  0xb1   : > { %1724 = vsyncadd (%p2278_p11), [#allocation10], 4294965248  ;;  %vm481_vm0 = vcmask (!%p1252_p12), 31744   ;;  %v1762_v0 = vmov (!%p1252_p12), 0.0  }
  0xb2   : > { %480 = sbr.rel (%p1252_p12) target bundleno = 185 (0xb9), region = 84  ;;  %482 = vst.msk [vmem:[#allocation2] sm:$0xff] (!%p1252_p12), %vm481_vm0, %v1762_v0  ;;  %483 = vst.msk [vmem:[#allocation2 + $0x8] sm:$0xff] (!%p1252_p12), %vm481_vm0, %v1762_v0 }
  0xb9 PF: > { %vm501_vm1 = vcmask 1043456   ;;  %v587_v1 = vld [vmem:[%s2071_s0] sm:$0x3]  ;;  %v588_v5 = vld [vmem:[%s2071_s0 + $0x2] sm:$0x3]  ;;  %v534_v55 = vlaneseq  ;;  %vm568_vm2 = vcmask 1041409  }
  0xba   : > { %v485_v2 = vld [vmem:[%s2064_s27] sm:$0x3]  ;;  %v595_v3 = vunpack.c.l.bf16 %v587_v1  ;;  %v486_v6 = vld [vmem:[%s2064_s27 + $0x2] sm:$0x3]  ;;  %v596_v7 = vunpack.c.l.bf16 %v588_v5  ;;  %v589_v9 = vld [vmem:[%s2071_s0 + $0x4] sm:$0x3] }
  0xbb   : > { %v493_v4 = vunpack.c.l.bf16 %v485_v2  ;;  %v494_v8 = vunpack.c.l.bf16 %v486_v6  ;;  %v487_v10 = vld [vmem:[%s2064_s27 + $0x4] sm:$0x3]  ;;  %v597_v15 = vunpack.c.l.bf16 %v589_v9  ;;  %v590_v17 = vld [vmem:[%s2071_s0 + $0x6] sm:$0x3]  ;;  %v591_v23 = vld [vmem:[%s2071_s0 + $0x8] sm:$0x3] }
  0xbc   : > { %v603_v11 = vsel %vm501_vm1, %v595_v3, 0.0  ;;  %v606_v13 = vsel %vm501_vm1, %v596_v7, 0.0  ;;  %v495_v16 = vunpack.c.l.bf16 %v487_v10  ;;  %v488_v18 = vld [vmem:[%s2064_s27 + $0x6] sm:$0x3]  ;;  %v598_v21 = vunpack.c.l.bf16 %v590_v17  ;;  %v489_v24 = vld [vmem:[%s2064_s27 + $0x8] sm:$0x3] }
  0xbd   : > { %v502_v12 = vsel %vm501_vm1, %v493_v4, 0.0  ;;  %604 = vadd.xlane.f32.xlu1 %v603_v11  ;;  %v505_v14 = vsel %vm501_vm1, %v494_v8, 0.0  ;;  %v609_v19 = vsel %vm501_vm1, %v597_v15, 0.0  ;;  %v496_v22 = vunpack.c.l.bf16 %v488_v18  ;;  %v592_v29 = vld [vmem:[%s2071_s0 + $0xa] sm:$0x3]  ;;  %p1253_p4 = scmp.ne.s32.totalorder %s1743_s16, 1 }
  0xbe   : > { %503 = vadd.xlane.f32.xlu0 %v502_v12  ;;  %v508_v20 = vsel %vm501_vm1, %v495_v16, 0.0  ;;  %v612_v25 = vsel %vm501_vm1, %v598_v21, 0.0  ;;  %v599_v27 = vunpack.c.l.bf16 %v591_v23  ;;  %v497_v28 = vunpack.c.l.bf16 %v489_v24  ;;  %v490_v30 = vld [vmem:[%s2064_s27 + $0xa] sm:$0x3]  ;;  %v593_v35 = vld [vmem:[%s2071_s0 + $0xc] sm:$0x3] }
  0xbf   : > { %v511_v26 = vsel %vm501_vm1, %v496_v22, 0.0  ;;  %v600_v33 = vunpack.c.l.bf16 %v592_v29  ;;  %v498_v34 = vunpack.c.l.bf16 %v490_v30  ;;  %v491_v36 = vld [vmem:[%s2064_s27 + $0xc] sm:$0x3]  ;;  %v601_v39 = vunpack.c.l.bf16 %v593_v35  ;;  %v594_v41 = vld [vmem:[%s2071_s0 + $0xe] sm:$0x3]  ;;  %s2279_s7 = sld [smem:[#allocation20_spill]] (!%p1253_p4) }
  0xc0   : > { %v615_v31 = vsel %vm501_vm1, %v599_v27, 0.0  ;;  %v514_v32 = vsel %vm501_vm1, %v497_v28, 0.0  ;;  %v499_v40 = vunpack.c.l.bf16 %v491_v36  ;;  %v492_v42 = vld [vmem:[%s2064_s27 + $0xe] sm:$0x3]  ;;  %v602_v45 = vunpack.c.l.bf16 %v594_v41  ;;  %s2280_s25 = sld [smem:[#allocation22_spill]] (!%p1253_p4)  ;;  %s2281_s11 = sld [smem:[#allocation23_spill]] (!%p1253_p4) }
  0xc1   : > { %607 = vadd.xlane.f32.xlu1 %v606_v13  ;;  %v618_v37 = vsel %vm501_vm1, %v600_v33, 0.0  ;;  %v517_v38 = vsel %vm501_vm1, %v498_v34, 0.0  ;;  %v621_v43 = vsel %vm501_vm1, %v601_v39, 0.0  ;;  %v500_v46 = vunpack.c.l.bf16 %v492_v42  ;;  %v586_v29 = vld [vmem:[#allocation2 + $0x8] sm:$0xff]  ;;  %v686_v39 = vld [vmem:[%s2242_s2] sm:$0x3] (!%p1253_p4) }
  0xc2   : > { %506 = vadd.xlane.f32.xlu0 %v505_v14  ;;  %v520_v44 = vsel %vm501_vm1, %v499_v40, 0.0  ;;  %v624_v47 = vsel %vm501_vm1, %v602_v45, 0.0  ;;  %v535_v58 = vand.u32 127, %v534_v55  ;;  %v537_v59 = vshrl.u32 %v534_v55, 7  ;;  %v1487_v45 = vld [vmem:[#allocation8] sm:$0xff] (!%p1253_p4)  }
  0xc3   : > { %v523_v48 = vsel %vm501_vm1, %v500_v46, 0.0  ;;  %vm570_vm3 = vcmask 1042434   ;;  %vm572_vm4 = vcmask 1043459   ;;  %vm574_vm5 = vcmask 1044484   ;;  %v1495_v55 = vld [vmem:[#allocation9] sm:$0xff] (!%p1253_p4)  }
  0xc4   : > { %v2118_v62 = vsub.s32 %v535_v58, %v537_v59  ;;  %vm576_vm6 = vcmask 1045509   ;;  %vm578_vm7 = vcmask 1046534   ;;  %vm580_vm8 = vcmask 1047559   ;;  %v1498_v58 = vld [vmem:[#allocation9 + $0x18] sm:$0xff] (!%p1253_p4)   ;;  %v1499_v59 = vld [vmem:[#allocation9 + $0x20] sm:$0xff] (!%p1253_p4)  }
  0xc5   : > { %610 = vadd.xlane.f32.xlu1 %v609_v19  ;;  %vm584_vm9 = vcmask 31744   ;;  %vm697_vm10 = vcmask (!%p1253_p4), 1041408   ;;  %v1763_v41 = vmov (!%p1253_p4), 0.0   ;;  %vm1764_vm11 = vmmov (!%p1253_p4), 0  }
  0xc6   : > { %509 = vadd.xlane.f32.xlu0 %v508_v20  ;;  %1316 = vmatprep.subr.bf16.mxu0 (!%p1253_p4), %v1763_v41  ;;  %v699_v42 = vsel (!%p1253_p4), %vm697_vm10, %v686_v39, 0  ;;  %vm1109_vm12 = vcmask (!%p1253_p4), 57344  }
  0xc7   : > { %1318 = vmatprep.mubr.msk.bf16.mxu0 (!%p1253_p4), %vm1764_vm11, %v1763_v41  ;;  %1317 = vmatpush3.bf16.msra.mxu0 (!%p1253_p4), %v699_v42 }
  0xc8   : > { %1322 = vmatprep.subr.bf16.mxu1 (!%p1253_p4), %v1763_v41  ;;  %1338 = vmatprep.mubr.msk.bf16.mxu1 (!%p1253_p4), %vm1764_vm11, %v1763_v41 }
  0xc9   : > { %613 = vadd.xlane.f32.xlu1 %v612_v25  ;;  %1323 = vmatpush3.bf16.msra.mxu1 (!%p1253_p4), %v1487_v45 }
  0xca   : > { %512 = vadd.xlane.f32.xlu0 %v511_v26  ;;  %1324 = vmatprep.subr.bf16.mxu1 (!%p1253_p4), %v1763_v41 }
  0xcb   : > { %1342 = vmatprep.subr.bf16.mxu0 (!%p1253_p4), %v1763_v41 }
  0xcd   : > { %616 = vadd.xlane.f32.xlu1 %v615_v31  ;;  %v484_v31 = vld [vmem:[#allocation2] sm:$0xff] }
  0xce   : > { %515 = vadd.xlane.f32.xlu0 %v514_v32 }
  0xd1   : > { %619 = vadd.xlane.f32.xlu1 %v618_v37 }
  0xd2   : > { %518 = vadd.xlane.f32.xlu0 %v517_v38 }
  0xd5   : > { %622 = vadd.xlane.f32.xlu1 %v621_v43 }
  0xd6   : > { %521 = vadd.xlane.f32.xlu0 %v520_v44 }
  0xd9   : > { %625 = vadd.xlane.f32.xlu1 %v624_v47  ;;  %v1488_v47 = vld [vmem:[#allocation8 + $0x8] sm:$0xff] (!%p1253_p4)  }
  0xda   : > { %524 = vadd.xlane.f32.xlu0 %v523_v48  ;;  %1325 = vmatpush3.bf16.msra.mxu1 (!%p1253_p4), %v1488_v47 }
  0xdb   : > { %1326 = vmatprep.subr.bf16.mxu1 (!%p1253_p4), %v1763_v41 }
 0x14a   : > { %v605_v49 = vpop.xlane.xlu1 %604 }
 0x14b   : > { %v504_v50 = vpop.xlane.xlu0 %503  ;;  %v638_v5 = vrot.slane %v605_v49, %v2118_v62  ;;  %v1489_v49 = vld [vmem:[#allocation8 + $0x10] sm:$0xff] (!%p1253_p4)  }
 0x14c   : > { %v539_v6 = vrot.slane %v504_v50, %v2118_v62  ;;  %v1490_v50 = vld [vmem:[#allocation8 + $0x18] sm:$0xff] (!%p1253_p4)   ;;  %1327 = vmatpush3.bf16.msra.mxu1 (!%p1253_p4), %v1489_v49 }
 0x14d   : > { %1328 = vmatprep.subr.bf16.mxu1 (!%p1253_p4), %v1763_v41 }
 0x14e   : > { %v608_v51 = vpop.xlane.xlu1 %607 }
 0x14f   : > { %v507_v52 = vpop.xlane.xlu0 %506  ;;  %v642_v1 = vrot.slane %v608_v51, %v2118_v62  ;;  %v1491_v51 = vld [vmem:[#allocation8 + $0x20] sm:$0xff] (!%p1253_p4)  }
 0x150   : > { %v543_v2 = vrot.slane %v507_v52, %v2118_v62  ;;  %1329 = vmatpush3.bf16.msra.mxu1 (!%p1253_p4), %v1490_v50  ;;  %v1492_v52 = vld [vmem:[#allocation8 + $0x28] sm:$0xff] (!%p1253_p4)  }
 0x151   : > { %v667_v13 = vsel %vm568_vm2, %v642_v1, %v638_v5  ;;  %1330 = vmatprep.subr.bf16.mxu1 (!%p1253_p4), %v1763_v41 }
 0x152   : > { %v611_v53 = vpop.xlane.xlu1 %610  ;;  %v569_v14 = vsel %vm568_vm2, %v543_v2, %v539_v6 }
 0x153   : > { %v510_v54 = vpop.xlane.xlu0 %509  ;;  %v646_v3 = vrot.slane %v611_v53, %v2118_v62  ;;  %v1493_v53 = vld [vmem:[#allocation8 + $0x30] sm:$0xff] (!%p1253_p4)  }
 0x154   : > { %v547_v4 = vrot.slane %v510_v54, %v2118_v62  ;;  %1331 = vmatpush3.bf16.msra.mxu1 (!%p1253_p4), %v1491_v51  ;;  %v1494_v54 = vld [vmem:[#allocation8 + $0x38] sm:$0xff] (!%p1253_p4)  }
 0x155   : > { %v668_v17 = vsel %vm570_vm3, %v646_v3, %v667_v13  ;;  %1332 = vmatprep.subr.bf16.mxu1 (!%p1253_p4), %v1763_v41  ;;  %v1506_v13 = vld [vmem:[#allocation11 + $0x18] sm:$0xff] (!%p1253_p4)  }
 0x156   : > { %v614_v56 = vpop.xlane.xlu1 %613  ;;  %v571_v18 = vsel %vm570_vm3, %v547_v4, %v569_v14  ;;  %v1507_v14 = vld [vmem:[#allocation11 + $0x20] sm:$0xff] (!%p1253_p4)  }
 0x157   : > { %v513_v57 = vpop.xlane.xlu0 %512  ;;  %v650_v7 = vrot.slane %v614_v56, %v2118_v62  ;;  %v1496_v56 = vld [vmem:[#allocation9 + $0x8] sm:$0xff] (!%p1253_p4)  }
 0x158   : > { %v551_v8 = vrot.slane %v513_v57, %v2118_v62  ;;  %1333 = vmatpush3.bf16.msra.mxu1 (!%p1253_p4), %v1492_v52  ;;  %v1497_v57 = vld [vmem:[#allocation9 + $0x10] sm:$0xff] (!%p1253_p4)  }
 0x159   : > { %v669_v21 = vsel %vm572_vm4, %v650_v7, %v668_v17  ;;  %1334 = vmatprep.subr.bf16.mxu1 (!%p1253_p4), %v1763_v41 }
 0x15a   : > { %v617_v60 = vpop.xlane.xlu1 %616  ;;  %v573_v22 = vsel %vm572_vm4, %v551_v8, %v571_v18  ;;  %v1501_v8 = vld [vmem:[#allocation9 + $0x30] sm:$0xff] (!%p1253_p4)  }
 0x15b   : > { %v516_v61 = vpop.xlane.xlu0 %515  ;;  %v654_v9 = vrot.slane %v617_v60, %v2118_v62  ;;  %v1500_v60 = vld [vmem:[#allocation9 + $0x28] sm:$0xff] (!%p1253_p4)  }
 0x15c   : > { %v555_v10 = vrot.slane %v516_v61, %v2118_v62  ;;  %1335 = vmatpush3.bf16.msra.mxu1 (!%p1253_p4), %v1493_v53  ;;  %v1254_v61 = vld [vmem:[%s2243_s3] ss:$0 sm:$0xff] (!%p1253_p4) }
 0x15d   : > { %v670_v23 = vsel %vm574_vm5, %v654_v9, %v669_v21  ;;  %1336 = vmatprep.subr.bf16.mxu1 (!%p1253_p4), %v1763_v41  ;;  %v1502_v9 = vld [vmem:[#allocation9 + $0x38] sm:$0xff] (!%p1253_p4)  }
 0x15e   : > { %v620_v63 = vpop.xlane.xlu1 %619  ;;  %v575_v24 = vsel %vm574_vm5, %v555_v10, %v573_v22  ;;  %v1503_v10 = vld [vmem:[#allocation11] sm:$0xff] (!%p1253_p4)  }
 0x15f   : > { %v519_v0 = vpop.xlane.xlu0 %518  ;;  %v658_v15 = vrot.slane %v620_v63, %v2118_v62 }
 0x160   : > { %v559_v16 = vrot.slane %v519_v0, %v2118_v62  ;;  %1337 = vmatpush3.bf16.msra.mxu1 (!%p1253_p4), %v1494_v54 }
 0x161   : > { %v671_v27 = vsel %vm576_vm6, %v658_v15, %v670_v23  ;;  %1362 = vmatprep.subr.bf16.mxu1 (!%p1253_p4), %v1763_v41  ;;  %v1508_v15 = vld [vmem:[#allocation11 + $0x28] sm:$0xff] (!%p1253_p4)  }
 0x162   : > { %v623_v11 = vpop.xlane.xlu1 %622  ;;  %v577_v28 = vsel %vm576_vm6, %v559_v16, %v575_v24  ;;  %v1256_v16 = vld [vmem:[%s2279_s7] ss:$0 sm:$0xff] (!%p1253_p4) }
 0x163   : > { %v522_v12 = vpop.xlane.xlu0 %521  ;;  %v662_v19 = vrot.slane %v623_v11, %v2118_v62  ;;  %v1504_v11 = vld [vmem:[#allocation11 + $0x8] sm:$0xff] (!%p1253_p4)   ;;  %v1509_v24 = vld [vmem:[#allocation11 + $0x30] sm:$0xff] (!%p1253_p4)  }
 0x164   : > { %v563_v20 = vrot.slane %v522_v12, %v2118_v62  ;;  %v1505_v12 = vld [vmem:[#allocation11 + $0x10] sm:$0xff] (!%p1253_p4)  }
 0x165   : > { %v672_v33 = vsel %vm578_vm7, %v662_v19, %v671_v27 }
 0x166   : > { %v626_v25 = vpop.xlane.xlu1 %625  ;;  %v579_v34 = vsel %vm578_vm7, %v563_v20, %v577_v28 }
 0x167   : > { %v525_v26 = vpop.xlane.xlu0 %524  ;;  %v666_v30 = vrot.slane %v626_v25, %v2118_v62  ;;  %680 = sbr.rel (%p1253_p4) target bundleno = 1563 (0x61b), region = 88  ;;  %v1510_v25 = vld [vmem:[#allocation11 + $0x38] sm:$0xff] (!%p1253_p4)  }
 0x168   : > { %v567_v32 = vrot.slane %v525_v26, %v2118_v62  ;;  %v1265_v26 = vld [vmem:[%s2280_s25] ss:$0 sm:$0xff] (!%p1253_p4) }
 0x169   : > { %v673_v35 = vsel %vm580_vm8, %v666_v30, %v672_v33 }
 0x16a   : > { %v581_v36 = vsel %vm580_vm8, %v567_v32, %v579_v34  ;;  %v675_v37 = vadd.f32 %v673_v35, %v586_v29 }
 0x16b   : > { %v583_v38 = vadd.f32 %v581_v36, %v484_v31  ;;  %v1274_v36 = vld [vmem:[%s2281_s11] ss:$0 sm:$0xff] (!%p1253_p4) }
 0x16c   : > { %676 = vst.msk [vmem:[#allocation2 + $0x8] sm:$0xff] %vm584_vm9, %v675_v37 }
 0x16d   : > { %585 = vst.msk [vmem:[#allocation2] sm:$0xff] %vm584_vm9, %v583_v38 }
 0x173   : > { %v682_v43 = vld [vmem:[#allocation2 + $0x8] sm:$0xff] }
 0x174   : > { %v681_v40 = vld [vmem:[#allocation2] sm:$0xff]  ;;  %v684_v46 = vmul.f32 0.00390625, %v682_v43 }
 0x175   : > { %v683_v44 = vmul.f32 0.00390625, %v681_v40 }
 0x177   : > { %v685_v48 = vpack.c.bf16 %v684_v46, %v683_v44 }
 0x179   : > { %1319 = vmatmul.mubr.msk.bf16.vlgmr.msra.gmra.mrb[0].mxu0 %vm584_vm9, %v685_v48 }
 0x17a   : > { %1358 = vmatprep.mubr.msk.bf16.mxu0 %vm1764_vm11, %v1763_v41  ;;  %1343 = vmatpush3.bf16.msra.mxu0 %v1495_v55 }
 0x17b   : > { %1344 = vmatprep.subr.bf16.mxu0 %v1763_v41 }
 0x17e   : > { %1345 = vmatpush3.bf16.msra.mxu0 %v1496_v56 }
 0x17f   : > { %1346 = vmatprep.subr.bf16.mxu0 %v1763_v41 }
 0x182   : > { %1347 = vmatpush3.bf16.msra.mxu0 %v1497_v57 }
 0x183   : > { %1348 = vmatprep.subr.bf16.mxu0 %v1763_v41 }
 0x186   : > { %1349 = vmatpush3.bf16.msra.mxu0 %v1498_v58 }
 0x187   : > { %1350 = vmatprep.subr.bf16.mxu0 %v1763_v41 }
 0x18a   : > { %1351 = vmatpush3.bf16.msra.mxu0 %v1499_v59 }
 0x18b   : > { %1352 = vmatprep.subr.bf16.mxu0 %v1763_v41 }
 0x18e   : > { %1353 = vmatpush3.bf16.msra.mxu0 %v1500_v60 }
 0x18f   : > { %1354 = vmatprep.subr.bf16.mxu0 %v1763_v41 }
 0x192   : > { %1355 = vmatpush3.bf16.msra.mxu0 %v1501_v8 }
 0x193   : > { %1356 = vmatprep.subr.bf16.mxu0 %v1763_v41 }
 0x196   : > { %1357 = vmatpush3.bf16.msra.mxu0 %v1502_v9 }
 0x24c   : > { %v735_v63 = vpop.f32.mrb[0].mxu0 }
 0x24d   : > { %v736_v0 = vadd.f32 %v1254_v61, %v735_v63  ;;  %v1320_v1 = vpop.f32.mrb[1].mxu0 }
 0x24e   : > { %v738_v2 = vpop.f32.mrb[2].mxu0 }
 0x24f   : > { %v739_v3 = vadd.f32 %v1254_v61, %v738_v2  ;;  %v1321_v4 = vpop.f32.mrb[3].mxu0  ;;  %v742_v5 = vmax.f32 %v736_v0, 0.0 }
 0x251   : > { %v743_v6 = vmax.f32 %v739_v3, 0.0 }
 0x253   : > { %v744_v7 = vpack.c.bf16 %v743_v6, %v742_v5 }
 0x255   : > { %1339 = vmatmul.mubr.bf16.vlgmr.msra.gmra.mrb[0].mxu1 %v744_v7 }
 0x256   : > { %1378 = vmatprep.mubr.msk.bf16.mxu1 %vm1764_vm11, %v1763_v41  ;;  %1363 = vmatpush3.bf16.msra.mxu1 %v1503_v10 }
 0x257   : > { %1364 = vmatprep.subr.bf16.mxu1 %v1763_v41 }
 0x25a   : > { %1365 = vmatpush3.bf16.msra.mxu1 %v1504_v11 }
 0x25b   : > { %1366 = vmatprep.subr.bf16.mxu1 %v1763_v41 }
 0x25e   : > { %1367 = vmatpush3.bf16.msra.mxu1 %v1505_v12 }
 0x25f   : > { %1368 = vmatprep.subr.bf16.mxu1 %v1763_v41 }
 0x262   : > { %1369 = vmatpush3.bf16.msra.mxu1 %v1506_v13 }
 0x263   : > { %1370 = vmatprep.subr.bf16.mxu1 %v1763_v41 }
 0x266   : > { %1371 = vmatpush3.bf16.msra.mxu1 %v1507_v14 }
 0x267   : > { %1372 = vmatprep.subr.bf16.mxu1 %v1763_v41 }
 0x26a   : > { %1373 = vmatpush3.bf16.msra.mxu1 %v1508_v15 }
 0x26b   : > { %1374 = vmatprep.subr.bf16.mxu1 %v1763_v41 }
 0x26e   : > { %1375 = vmatpush3.bf16.msra.mxu1 %v1509_v24 }
 0x26f   : > { %1376 = vmatprep.subr.bf16.mxu1 %v1763_v41 }
 0x272   : > { %1377 = vmatpush3.bf16.msra.mxu1 %v1510_v25 }
 0x328   : > { %v850_v17 = vpop.f32.mrb[0].mxu1 }
 0x329   : > { %v1340_v18 = vpop.f32.mrb[1].mxu1  ;;  %v851_v20 = vadd.f32 %v1256_v16, %v850_v17 }
 0x32a   : > { %v853_v19 = vpop.f32.mrb[2].mxu1 }
 0x32b   : > { %v854_v21 = vadd.f32 %v1256_v16, %v853_v19  ;;  %v1341_v22 = vpop.f32.mrb[3].mxu1 }
 0x32d   : > { %v857_v23 = vpack.c.bf16 %v854_v21, %v851_v20 }
 0x32f   : > { %1359 = vmatmul.mubr.bf16.vlgmr.msra.gmra.mrb[4].mxu0 %v857_v23 }
 0x402   : > { %v963_v27 = vpop.f32.mrb[4].mxu0 }
 0x403   : > { %v964_v28 = vadd.f32 %v1265_v26, %v963_v27  ;;  %v1360_v29 = vpop.f32.mrb[5].mxu0 }
 0x404   : > { %v966_v30 = vpop.f32.mrb[6].mxu0 }
 0x405   : > { %v967_v31 = vadd.f32 %v1265_v26, %v966_v30  ;;  %v1361_v32 = vpop.f32.mrb[7].mxu0  ;;  %v970_v33 = vmax.f32 %v964_v28, 0.0 }
 0x407   : > { %v971_v34 = vmax.f32 %v967_v31, 0.0 }
 0x409   : > { %v972_v35 = vpack.c.bf16 %v971_v34, %v970_v33 }
 0x40b   : > { %1379 = vmatmul.mubr.bf16.vlgmr.msra.gmra.mrb[4].mxu1 %v972_v35 }
 0x4de   : > { %v1078_v37 = vpop.f32.mrb[4].mxu1 }
 0x4df   : > { %v1079_v38 = vadd.f32 %v1274_v36, %v1078_v37  ;;  %v1380_v39 = vpop.f32.mrb[5].mxu1 }
 0x4e0   : > { %v1081_v40 = vpop.f32.mrb[6].mxu1 }
 0x4e1   : > { %v1082_v41 = vadd.f32 %v1274_v36, %v1081_v40  ;;  %v1381_v42 = vpop.f32.mrb[7].mxu1  ;;  %v1085_v43 = vmul.f32 %v1079_v38, %v1079_v38 }
 0x4e3   : > { %1087 = vadd.xlane.f32.xlu0 %v1085_v43  ;;  %v1086_v44 = vmul.f32 %v1082_v41, %v1082_v41 }
 0x4e7   : > { %1089 = vadd.xlane.f32.xlu0 %v1086_v44 }
 0x570   : > { %v1088_v45 = vpop.xlane.xlu0 %1087 }
 0x571   : > { %v1091_v46 = vmax.f32 %v1088_v45, 1e-24 }
 0x573   : > { %1511 = vrsqrt.f32 %v1091_v46 }
 0x574   : > { %v1090_v47 = vpop.xlane.xlu0 %1089 }
 0x575   : > { %v1092_v48 = vmax.f32 %v1090_v47, 1e-24 }
 0x577   : > { %1513 = vrsqrt.f32 %v1092_v48 }
 0x57d   : > { %v1512_v49 = vpop.eup %1511 }
 0x57e   : > { %v1095_v50 = vmul.f32 %v1512_v49, %v1079_v38 }
 0x580   : > { %v1098_v54 = vmul.f32 %v1095_v50, %v854_v21 }
 0x581   : > { %v1514_v51 = vpop.eup %1513 }
 0x582   : > { %v1096_v52 = vmul.f32 %v1514_v51, %v1082_v41 }
 0x584   : > { %v1097_v53 = vmul.f32 %v1096_v52, %v851_v20 }
 0x586   : > { %v1099_v55 = vadd.f32 %v1098_v54, %v1097_v53 }
 0x588   : > { %1100 = vadd.xlane.f32.xlu1 %v1099_v55 }
 0x615   : > { %v1101_v56 = vpop.xlane.xlu1 %1100 }
 0x616   : > { %v1102_v57 = vmul.f32 -0.5, %v1101_v56 }
 0x618   : > { %v1107_v58 = vrot.slane %v1102_v57, %v2118_v62 }
 0x61a   : > { %1110 = vst.msk [vmem:[#allocation12] sm:$0x1] %vm1109_vm12, %v1107_v58 }
 0x61b PF: > { %p1426_p7 = scmp.eq.s32.totalorder %s1850_s19, 1  ;;  %s1765_s6 = smov [#allocation12]  }
 0x61c   : > { %s1120_s13 = sshll.u32 %s1765_s6, 4  ;;  %s1121_s13 = int_to_ptr.vmem [resolvable:$true] %s1120_s13 }
 0x61d   : > { %s1659_s9 = scalar_lea.vmem %s1121_s13, 16  ;;  %s1665_s27 = scalar_lea.vmem %s1121_s13, 32 }
 0x61e   : > { %p1660_p9 = scmp.ne.s32.totalorder %s1121_s13, %s1659_s9  ;;  %p1666_p1 = scmp.lt.s32.totalorder %s1121_s13, %s1121_s13 }
 0x61f   : > { %p1667_p3 = scmp.lt.s32.totalorder %s1665_s27, %s1659_s9 }
 0x620   : > { %p1661_p5 = pnand %p1660_p9, %p1426_p7 }
 0x621   : > { %p1668_p2 = por %p1667_p3, %p1666_p1 }
 0x622   : > { %p1662_p10 = pneg %p1661_p5 }
 0x624   : > { %p1669_p13 = pnand %p1668_p2, %p1662_p10 }
 0x626   : > { %1672 = shalt.err (!%p1669_p13)
}
 0x627   : > { %s2282_s0 = sld [smem:[#allocation24_spill]] }
 0x62d   : > { %s1673_s21 = scalar_lea.hbm %s2282_s0, 16 }
 0x62e   : > { %p1674_p0 = scmp.ne.s32.totalorder %s2282_s0, %s1673_s21  ;;  %p1679_p11 = scmp.lt.u32.totalorder %s1673_s21, %s2282_s0 }
 0x630   : > { %p1675_p6 = pnand %p1674_p0, %p1426_p7 }
 0x632   : > { %p1676_p8 = pneg %p1675_p6 }
 0x634   : > { %p1681_p12 = pnand %p1679_p11, %p1676_p8 }
 0x636   : > { %1684 = shalt.err (!%p1681_p12)
}
 0x637   : > { %1399 = dma.vmem_to_hbm [thread:$0]  (%p1426_p7), %s1121_s13, 16, %s2282_s0, [#allocation5]  }
 0x638   : > { %1726 = dma.done.wait (%p1426_p7), [#allocation5], 16  }
 0x639   : > { %1728 = vsyncadd (%p1426_p7), [#allocation5], 4294967280 }
 0x63a PF: > { %s28_s18 = sadd.s32 1, %s1751_s18   ;;  %s2283_s13 = smov %s1735_s14 }
 0x63b   : > { %p25_p4 = scmp.ge.s32.totalorder %s28_s18, 4   ;;  %s2284_s14 = smov %s1739_s15 }
 0x63c   : > { %s2285_s15 = smov %s1988_s24  ;;  %s2286_s16 = smov %s1747_s17 }
 0x63d   : > { %s2287_s17 = smov %s2289_s23  ;;  %27 = sbr.rel (!%p25_p4) target bundleno = 16 (0x10), region = 131 }
 0x644   :  { %1133 = vsyncpa [#allocation4], 1 }
 0x645   :  { %1135 = vsyncpa [#allocation4 + $0x1], 1 }
 0x646   :  { %1136 = vsyncpa [#allocation7], 1 }
 0x647   :  { %1138 = vsyncpa [#allocation7 + $0x1], 1 }
 0x648   :  { %1139 = vsyncpa [#allocation10], 1 }
 0x649   :  { %1140 = vsyncpa [#allocation5], 1 }
 0x64a   :  { %1142 = vsyncpa [#allocation5 + $0x1], 1 }

</bundles_post_ra>
